<compile_context>
chip_gen: v7x
topology: tpu7x:2x2x1
jax: 0.10.0
libtpu: 0.0.40
codegen_flags: <defaults>
</compile_context>

<pallas_src>
import functools

import jax
import jax.numpy as jnp
from jax.experimental import pallas as pl
from jax.experimental.pallas import tpu as pltpu

COMPUTE_DTYPE = jnp.bfloat16  # set to jnp.float32 for exact torch-f32 matmul parity


def _embed_kernel(a_ref, p_ref, n_ref, w1_ref, b1_ref, w2_ref, b2_ref,
                  ea_ref, ep_ref, en_ref, *, compute_dtype):
    """One row-block of: flatten -> Linear -> ReLU -> Linear -> L2 normalize,
    applied to the anchor / pos / neg segments with shared (VMEM-resident)
    weights."""
    w1 = w1_ref[...]
    b1 = b1_ref[...]
    w2 = w2_ref[...]
    b2 = b2_ref[...]

    def embed(x_ref, o_ref):
        # f32 -> bf16 cast happens here (no extra HBM pass in the wrapper).
        x = x_ref[...].astype(compute_dtype)
        h = jnp.dot(x, w1, preferred_element_type=jnp.float32) + b1
        h = jnp.maximum(h, 0.0)
        e = jnp.dot(h.astype(compute_dtype), w2,
                    preferred_element_type=jnp.float32) + b2
        # F.normalize(e, p=2, dim=1): e / max(||e||_2, 1e-12)
        #   == e * rsqrt(max(sum(e^2), 1e-24))   (rsqrt -> EUP slot)
        # Padded output columns are exactly zero, so they do not perturb sumsq.
        sumsq = jnp.sum(e * e, axis=-1, keepdims=True)
        o_ref[...] = e * jax.lax.rsqrt(jnp.maximum(sumsq, jnp.float32(1e-24)))

    embed(a_ref, ea_ref)
    embed(p_ref, ep_ref)
    embed(n_ref, en_ref)


def make_triplet_net_forward(w1, b1, w2, b2, compute_dtype=COMPUTE_DTYPE):
    """Build a jitted forward(anchor, pos, neg) for TripletNet.

    Weight prep (bf16 cast + lane padding of the output projection) is hoisted
    here so it happens exactly once, not per call.
    """
    in_dim, hidden = w1.shape
    embed_dim = w2.shape[1]
    embed_pad = max(128, ((embed_dim + 127) // 128) * 128)  # lane-dense output

    # One-time weight preparation (hoisted out of the per-call path).
    w1c = jnp.asarray(w1, compute_dtype)
    w2c = jnp.zeros((hidden, embed_pad), compute_dtype)
    w2c = w2c.at[:, :embed_dim].set(jnp.asarray(w2, compute_dtype))
    b1f = jnp.asarray(b1, jnp.float32).reshape(1, hidden)
    b2f = jnp.zeros((1, embed_pad), jnp.float32)
    b2f = b2f.at[:, :embed_dim].set(jnp.asarray(b2, jnp.float32))

    kernel = functools.partial(_embed_kernel, compute_dtype=compute_dtype)

    @jax.jit
    def forward(anchor, pos, neg):
        B = anchor.shape[0]
        a = anchor.reshape(B, in_dim)
        p = pos.reshape(B, in_dim)
        n = neg.reshape(B, in_dim)

        # Row tile: full batch for small B (grid of 1); 512-row (256-aligned)
        # tiles for large batches -> pipelined activation DMA + megacore sharding.
        # With in_dim=1024 a 512-row f32 tile is ~2 MiB, comfortably inside the
        # v7x 32 MiB default scoped VMEM even with double buffering x3 inputs.
        tm = B if B <= 512 else 512
        grid = (pl.cdiv(B, tm),)

        row_spec = pl.BlockSpec((tm, in_dim), lambda i: (i, 0))
        out_spec = pl.BlockSpec((tm, embed_pad), lambda i: (i, 0))
        const2 = lambda shape: pl.BlockSpec(shape, lambda i: (0, 0))  # resident

        ea, ep, en = pl.pallas_call(
            kernel,
            out_shape=tuple(
                jax.ShapeDtypeStruct((B, embed_pad), jnp.float32)
                for _ in range(3)),
            grid=grid,
            in_specs=[
                row_spec, row_spec, row_spec,
                const2((in_dim, hidden)), const2((1, hidden)),
                const2((hidden, embed_pad)), const2((1, embed_pad)),
            ],
            out_specs=[out_spec, out_spec, out_spec],
            compiler_params=pltpu.CompilerParams(
                dimension_semantics=("parallel",)),
        )(a, p, n, w1c, b1f, w2c, b2f)

        anchor_embedding = ea[:, :embed_dim]
        pos_embedding = ep[:, :embed_dim]
        neg_embedding = en[:, :embed_dim]

        # F.pairwise_distance(a, b, 2).pow(2) == sum((a - b + 1e-6)^2, axis=1).
        # Tiny (3 x B x embed_dim) op; fused by XLA right after the kernel, as
        # recommended instead of a lane-sparse (B, 2) kernel output.
        eps = jnp.float32(1e-6)
        dist_pos = jnp.sum((anchor_embedding - pos_embedding + eps) ** 2, axis=1)
        dist_neg = jnp.sum((anchor_embedding - neg_embedding + eps) ** 2, axis=1)

        return dist_pos, dist_neg, anchor_embedding, pos_embedding, neg_embedding

    return forward


if __name__ == "__main__":
    B, C, H, W = 2, 4, 16, 16
    in_dim = C * H * W      # 1024
    hidden = 128
    embed_dim = 32

    key = jax.random.PRNGKey(0)
    k_a, k_p, k_n, k_w1, k_b1, k_w2, k_b2 = jax.random.split(key, 7)

    anchor = jax.random.normal(k_a, (B, C, H, W), dtype=jnp.float32)
    pos = jax.random.normal(k_p, (B, C, H, W), dtype=jnp.float32)
    neg = jax.random.normal(k_n, (B, C, H, W), dtype=jnp.float32)

    # Deterministic synthetic parameters (no checkpoint load).
    w1 = jax.random.normal(k_w1, (in_dim, hidden), dtype=jnp.float32) * 0.02
    b1 = jax.random.normal(k_b1, (hidden,), dtype=jnp.float32) * 0.02
    w2 = jax.random.normal(k_w2, (hidden, embed_dim), dtype=jnp.float32) * 0.02
    b2 = jax.random.normal(k_b2, (embed_dim,), dtype=jnp.float32) * 0.02

    triplet_net_forward = make_triplet_net_forward(w1, b1, w2, b2)

    outs = triplet_net_forward(anchor, pos, neg)
    outs = jax.block_until_ready(outs)
    dist_pos, dist_neg, ae, pe, ne = outs

    assert dist_pos.shape == (B,) and dist_neg.shape == (B,)
    assert ae.shape == (B, embed_dim) and pe.shape == (B, embed_dim)
    assert ne.shape == (B, embed_dim)

    # Plain-JAX reference with matching matmul precision (bf16 operands, f32 acc).
    def ref_embed(xnchw):
        xc = xnchw.reshape(B, -1).astype(COMPUTE_DTYPE)
        h = jnp.dot(xc, w1.astype(COMPUTE_DTYPE),
                    preferred_element_type=jnp.float32) + b1
        h = jnp.maximum(h, 0.0)
        e = jnp.dot(h.astype(COMPUTE_DTYPE), w2.astype(COMPUTE_DTYPE),
                    preferred_element_type=jnp.float32) + b2
        return e / jnp.maximum(jnp.linalg.norm(e, axis=1, keepdims=True), 1e-12)

    ra, rp, rn = ref_embed(anchor), ref_embed(pos), ref_embed(neg)
    rdp = jnp.sum((ra - rp + 1e-6) ** 2, axis=1)
    rdn = jnp.sum((ra - rn + 1e-6) ** 2, axis=1)

    tol = 2e-3  # covers rsqrt-vs-divide and MXU accumulation-order differences
    assert jnp.allclose(dist_pos, rdp, atol=tol), (dist_pos, rdp)
    assert jnp.allclose(dist_neg, rdn, atol=tol), (dist_neg, rdn)
    assert jnp.allclose(ae, ra, atol=tol)
    assert jnp.allclose(pe, rp, atol=tol)
    assert jnp.allclose(ne, rn, atol=tol)

    print("KERNEL_OK")
</pallas_src>

<mosaic_0001>
module attributes {stable_mosaic.version = 11 : i64} {
  func.func @_embed_kernel(%arg0: i32, %arg1: memref<2x1024xf32, #tpu.memory_space<vmem>>, %arg2: memref<2x1024xf32, #tpu.memory_space<vmem>>, %arg3: memref<2x1024xf32, #tpu.memory_space<vmem>>, %arg4: memref<1024x128xbf16, #tpu.memory_space<vmem>>, %arg5: memref<1x128xf32, #tpu.memory_space<vmem>>, %arg6: memref<128x128xbf16, #tpu.memory_space<vmem>>, %arg7: memref<1x128xf32, #tpu.memory_space<vmem>>, %arg8: memref<2x128xf32, #tpu.memory_space<vmem>>, %arg9: memref<2x128xf32, #tpu.memory_space<vmem>>, %arg10: memref<2x128xf32, #tpu.memory_space<vmem>>) attributes {dimension_semantics = [#tpu.dimension_semantics<parallel>], iteration_bounds = array<i64: 1>, scalar_prefetch = 0 : i64, scratch_operands = 0 : i64, tpu.core_type = #tpu.core_type<tc>, window_params = [{transform_indices = @transform_0, window_bounds = array<i64: 2, 1024>}, {transform_indices = @transform_1, window_bounds = array<i64: 2, 1024>}, {transform_indices = @transform_2, window_bounds = array<i64: 2, 1024>}, {pipeline_mode = #tpu.pipeline_mode<synchronous>, transform_indices = @transform_3, window_bounds = array<i64: 1024, 128>}, {pipeline_mode = #tpu.pipeline_mode<synchronous>, transform_indices = @transform_4, window_bounds = array<i64: 1, 128>}, {pipeline_mode = #tpu.pipeline_mode<synchronous>, transform_indices = @transform_5, window_bounds = array<i64: 128, 128>}, {pipeline_mode = #tpu.pipeline_mode<synchronous>, transform_indices = @transform_6, window_bounds = array<i64: 1, 128>}, {transform_indices = @transform_7, window_bounds = array<i64: 2, 128>}, {transform_indices = @transform_8, window_bounds = array<i64: 2, 128>}, {transform_indices = @transform_9, window_bounds = array<i64: 2, 128>}]} {
    %c0 = arith.constant 0 : index
    %c0_0 = arith.constant 0 : index
    %0 = vector.load %arg4[%c0, %c0_0] : memref<1024x128xbf16, #tpu.memory_space<vmem>>, vector<1024x128xbf16>
    %c0_1 = arith.constant 0 : index
    %c0_2 = arith.constant 0 : index
    %1 = vector.load %arg5[%c0_1, %c0_2] : memref<1x128xf32, #tpu.memory_space<vmem>>, vector<1x128xf32>
    %c0_3 = arith.constant 0 : index
    %c0_4 = arith.constant 0 : index
    %2 = vector.load %arg6[%c0_3, %c0_4] : memref<128x128xbf16, #tpu.memory_space<vmem>>, vector<128x128xbf16>
    %c0_5 = arith.constant 0 : index
    %c0_6 = arith.constant 0 : index
    %3 = vector.load %arg7[%c0_5, %c0_6] : memref<1x128xf32, #tpu.memory_space<vmem>>, vector<1x128xf32>
    %c0_7 = arith.constant 0 : index
    %c0_8 = arith.constant 0 : index
    %4 = vector.load %arg1[%c0_7, %c0_8] : memref<2x1024xf32, #tpu.memory_space<vmem>>, vector<2x1024xf32>
    %5 = arith.truncf %4 : vector<2x1024xf32> to vector<2x1024xbf16>
    %cst = arith.constant dense<0.000000e+00> : vector<2x128xf32>
    %6 = tpu.matmul %5, %0, %cst {dimension_numbers = #tpu.dot_dimension_numbers<[1], [0], [0], [1], [0, 0, 1, 1], [], []>} : vector<2x1024xbf16>, vector<1024x128xbf16>, vector<2x128xf32> -> vector<2x128xf32>
    %7 = vector.broadcast %1 : vector<1x128xf32> to vector<2x128xf32>
    %8 = arith.addf %6, %7 : vector<2x128xf32>
    %cst_9 = arith.constant 0.000000e+00 : f32
    %9 = vector.broadcast %cst_9 : f32 to vector<2x128xf32>
    %10 = arith.maximumf %8, %9 : vector<2x128xf32>
    %11 = arith.truncf %10 : vector<2x128xf32> to vector<2x128xbf16>
    %cst_10 = arith.constant dense<0.000000e+00> : vector<2x128xf32>
    %12 = tpu.matmul %11, %2, %cst_10 {dimension_numbers = #tpu.dot_dimension_numbers<[1], [0], [0], [1], [0, 0, 1, 1], [], []>} : vector<2x128xbf16>, vector<128x128xbf16>, vector<2x128xf32> -> vector<2x128xf32>
    %13 = vector.broadcast %3 : vector<1x128xf32> to vector<2x128xf32>
    %14 = arith.addf %12, %13 : vector<2x128xf32>
    %15 = arith.mulf %14, %14 : vector<2x128xf32>
    %cst_11 = arith.constant dense<0.000000e+00> : vector<2xf32>
    %16 = vector.multi_reduction <add>, %15, %cst_11 [1] : vector<2x128xf32> to vector<2xf32>
    %17 = vector.shape_cast %16 : vector<2xf32> to vector<2x1xf32>
    %cst_12 = arith.constant 1.000000e-24 : f32
    %18 = vector.broadcast %cst_12 : f32 to vector<2x1xf32>
    %19 = arith.maximumf %17, %18 : vector<2x1xf32>
    %20 = math.rsqrt %19 : vector<2x1xf32>
    %21 = vector.broadcast %20 : vector<2x1xf32> to vector<2x128xf32>
    %22 = arith.mulf %14, %21 : vector<2x128xf32>
    %c0_13 = arith.constant 0 : index
    %c0_14 = arith.constant 0 : index
    %23 = vector.load %arg8[%c0_13, %c0_14] : memref<2x128xf32, #tpu.memory_space<vmem>>, vector<2x128xf32>
    tpu.vector_store %arg8[%c0_13, %c0_14], %22 {strides = array<i32>} : memref<2x128xf32, #tpu.memory_space<vmem>>, vector<2x128xf32>,
    %c0_15 = arith.constant 0 : index
    %c0_16 = arith.constant 0 : index
    %24 = vector.load %arg2[%c0_15, %c0_16] : memref<2x1024xf32, #tpu.memory_space<vmem>>, vector<2x1024xf32>
    %25 = arith.truncf %24 : vector<2x1024xf32> to vector<2x1024xbf16>
    %cst_17 = arith.constant dense<0.000000e+00> : vector<2x128xf32>
    %26 = tpu.matmul %25, %0, %cst_17 {dimension_numbers = #tpu.dot_dimension_numbers<[1], [0], [0], [1], [0, 0, 1, 1], [], []>} : vector<2x1024xbf16>, vector<1024x128xbf16>, vector<2x128xf32> -> vector<2x128xf32>
    %27 = vector.broadcast %1 : vector<1x128xf32> to vector<2x128xf32>
    %28 = arith.addf %26, %27 : vector<2x128xf32>
    %cst_18 = arith.constant 0.000000e+00 : f32
    %29 = vector.broadcast %cst_18 : f32 to vector<2x128xf32>
    %30 = arith.maximumf %28, %29 : vector<2x128xf32>
    %31 = arith.truncf %30 : vector<2x128xf32> to vector<2x128xbf16>
    %cst_19 = arith.constant dense<0.000000e+00> : vector<2x128xf32>
    %32 = tpu.matmul %31, %2, %cst_19 {dimension_numbers = #tpu.dot_dimension_numbers<[1], [0], [0], [1], [0, 0, 1, 1], [], []>} : vector<2x128xbf16>, vector<128x128xbf16>, vector<2x128xf32> -> vector<2x128xf32>
    %33 = vector.broadcast %3 : vector<1x128xf32> to vector<2x128xf32>
    %34 = arith.addf %32, %33 : vector<2x128xf32>
    %35 = arith.mulf %34, %34 : vector<2x128xf32>
    %cst_20 = arith.constant dense<0.000000e+00> : vector<2xf32>
    %36 = vector.multi_reduction <add>, %35, %cst_20 [1] : vector<2x128xf32> to vector<2xf32>
    %37 = vector.shape_cast %36 : vector<2xf32> to vector<2x1xf32>
    %cst_21 = arith.constant 1.000000e-24 : f32
    %38 = vector.broadcast %cst_21 : f32 to vector<2x1xf32>
    %39 = arith.maximumf %37, %38 : vector<2x1xf32>
    %40 = math.rsqrt %39 : vector<2x1xf32>
    %41 = vector.broadcast %40 : vector<2x1xf32> to vector<2x128xf32>
    %42 = arith.mulf %34, %41 : vector<2x128xf32>
    %c0_22 = arith.constant 0 : index
    %c0_23 = arith.constant 0 : index
    %43 = vector.load %arg9[%c0_22, %c0_23] : memref<2x128xf32, #tpu.memory_space<vmem>>, vector<2x128xf32>
    tpu.vector_store %arg9[%c0_22, %c0_23], %42 {strides = array<i32>} : memref<2x128xf32, #tpu.memory_space<vmem>>, vector<2x128xf32>,
    %c0_24 = arith.constant 0 : index
    %c0_25 = arith.constant 0 : index
    %44 = vector.load %arg3[%c0_24, %c0_25] : memref<2x1024xf32, #tpu.memory_space<vmem>>, vector<2x1024xf32>
    %45 = arith.truncf %44 : vector<2x1024xf32> to vector<2x1024xbf16>
    %cst_26 = arith.constant dense<0.000000e+00> : vector<2x128xf32>
    %46 = tpu.matmul %45, %0, %cst_26 {dimension_numbers = #tpu.dot_dimension_numbers<[1], [0], [0], [1], [0, 0, 1, 1], [], []>} : vector<2x1024xbf16>, vector<1024x128xbf16>, vector<2x128xf32> -> vector<2x128xf32>
    %47 = vector.broadcast %1 : vector<1x128xf32> to vector<2x128xf32>
    %48 = arith.addf %46, %47 : vector<2x128xf32>
    %cst_27 = arith.constant 0.000000e+00 : f32
    %49 = vector.broadcast %cst_27 : f32 to vector<2x128xf32>
    %50 = arith.maximumf %48, %49 : vector<2x128xf32>
    %51 = arith.truncf %50 : vector<2x128xf32> to vector<2x128xbf16>
    %cst_28 = arith.constant dense<0.000000e+00> : vector<2x128xf32>
    %52 = tpu.matmul %51, %2, %cst_28 {dimension_numbers = #tpu.dot_dimension_numbers<[1], [0], [0], [1], [0, 0, 1, 1], [], []>} : vector<2x128xbf16>, vector<128x128xbf16>, vector<2x128xf32> -> vector<2x128xf32>
    %53 = vector.broadcast %3 : vector<1x128xf32> to vector<2x128xf32>
    %54 = arith.addf %52, %53 : vector<2x128xf32>
    %55 = arith.mulf %54, %54 : vector<2x128xf32>
    %cst_29 = arith.constant dense<0.000000e+00> : vector<2xf32>
    %56 = vector.multi_reduction <add>, %55, %cst_29 [1] : vector<2x128xf32> to vector<2xf32>
    %57 = vector.shape_cast %56 : vector<2xf32> to vector<2x1xf32>
    %cst_30 = arith.constant 1.000000e-24 : f32
    %58 = vector.broadcast %cst_30 : f32 to vector<2x1xf32>
    %59 = arith.maximumf %57, %58 : vector<2x1xf32>
    %60 = math.rsqrt %59 : vector<2x1xf32>
    %61 = vector.broadcast %60 : vector<2x1xf32> to vector<2x128xf32>
    %62 = arith.mulf %54, %61 : vector<2x128xf32>
    %c0_31 = arith.constant 0 : index
    %c0_32 = arith.constant 0 : index
    %63 = vector.load %arg10[%c0_31, %c0_32] : memref<2x128xf32, #tpu.memory_space<vmem>>, vector<2x128xf32>
    tpu.vector_store %arg10[%c0_31, %c0_32], %62 {strides = array<i32>} : memref<2x128xf32, #tpu.memory_space<vmem>>, vector<2x128xf32>,
    return
  }
  func.func @transform_0(%arg0: i32) -> (i32, i32) {
    %c0_i32 = arith.constant 0 : i32
    %c0_i32_0 = arith.constant 0 : i32
    return %arg0, %c0_i32 : i32, i32
  }
  func.func @transform_1(%arg0: i32) -> (i32, i32) {
    %c0_i32 = arith.constant 0 : i32
    %c0_i32_0 = arith.constant 0 : i32
    return %arg0, %c0_i32 : i32, i32
  }
  func.func @transform_2(%arg0: i32) -> (i32, i32) {
    %c0_i32 = arith.constant 0 : i32
    %c0_i32_0 = arith.constant 0 : i32
    return %arg0, %c0_i32 : i32, i32
  }
  func.func @transform_3(%arg0: i32) -> (i32, i32) {
    %c0_i32 = arith.constant 0 : i32
    %c0_i32_0 = arith.constant 0 : i32
    %c0_i32_1 = arith.constant 0 : i32
    return %c0_i32, %c0_i32_0 : i32, i32
  }
  func.func @transform_4(%arg0: i32) -> (i32, i32) {
    %c0_i32 = arith.constant 0 : i32
    %c0_i32_0 = arith.constant 0 : i32
    %c0_i32_1 = arith.constant 0 : i32
    return %c0_i32, %c0_i32_0 : i32, i32
  }
  func.func @transform_5(%arg0: i32) -> (i32, i32) {
    %c0_i32 = arith.constant 0 : i32
    %c0_i32_0 = arith.constant 0 : i32
    %c0_i32_1 = arith.constant 0 : i32
    return %c0_i32, %c0_i32_0 : i32, i32
  }
  func.func @transform_6(%arg0: i32) -> (i32, i32) {
    %c0_i32 = arith.constant 0 : i32
    %c0_i32_0 = arith.constant 0 : i32
    %c0_i32_1 = arith.constant 0 : i32
    return %c0_i32, %c0_i32_0 : i32, i32
  }
  func.func @transform_7(%arg0: i32) -> (i32, i32) {
    %c0_i32 = arith.constant 0 : i32
    %c0_i32_0 = arith.constant 0 : i32
    return %arg0, %c0_i32 : i32, i32
  }
  func.func @transform_8(%arg0: i32) -> (i32, i32) {
    %c0_i32 = arith.constant 0 : i32
    %c0_i32_0 = arith.constant 0 : i32
    return %arg0, %c0_i32 : i32, i32
  }
  func.func @transform_9(%arg0: i32) -> (i32, i32) {
    %c0_i32 = arith.constant 0 : i32
    %c0_i32_0 = arith.constant 0 : i32
    return %arg0, %c0_i32 : i32, i32
  }
}

</mosaic_0001>

<bundles_post_ra>
// kernel: forward.1
= control target key start
LH: loop header
LB: loop body
LE: loop exit
PB: predicated region body
PF: predicated region fallthrough
CT: control target
= control target key end

     0   :  { %15 = vsyncpa [#allocation3], 0  ;;  %s1987_s30 = smov [#allocation2]   ;;  %s2552_s0 = inlined_call_operand.vmem [shape: f32[2,1024], index: 0, kind: input, shape index: {}]   ;;  %s2553_s1 = inlined_call_operand.vmem [shape: f32[2,1024], index: 1, kind: input, shape index: {}]   ;;  %s2554_s2 = inlined_call_operand.vmem [shape: f32[2,1024], index: 2, kind: input, shape index: {}]   ;;  %s2555_s3 = inlined_call_operand.hbm [shape: bf16[1024,128], index: 3, kind: input, shape index: {}]   ;;  %s2556_s4 = inlined_call_operand.vmem [shape: f32[1,128], index: 4, kind: input, shape index: {}]   ;;  %s2557_s5 = inlined_call_operand.vmem [shape: bf16[128,128], index: 5, kind: input, shape index: {}]   ;;  %s2558_s6 = inlined_call_operand.vmem [shape: f32[1,128], index: 6, kind: input, shape index: {}]   ;;  %s2559_s7 = inlined_call_operand.vmem [shape: f32[2,128], index: 7, kind: output, shape index: {0}]   ;;  %s2560_s8 = inlined_call_operand.vmem [shape: f32[2,128], index: 8, kind: output, shape index: {1}]   ;;  %s2561_s9 = inlined_call_operand.vmem [shape: f32[2,128], index: 9, kind: output, shape index: {2}]  }
   0x1   :  { %s27_s10 = sshll.u32 %s1987_s30, 4  ;;  %s1963_s13 = scalar_lea.hbm %s2555_s3, 8192  ;;  %s28_s10 = int_to_ptr.vmem [resolvable:$true] %s27_s10 }
   0x2   :  { %p1964_p0 = scmp.ne.s32.totalorder %s2555_s3, %s1963_s13  ;;  %p1967_p1 = scmp.lt.u32.totalorder %s1963_s13, %s2555_s3 }
   0x4   :  { %p1969_p2 = pnand %p1967_p1, %p1964_p0 }
   0x6   :  { %1972 = shalt.err (!%p1969_p2)
}
   0x7   :  { %s1973_s18 = scalar_lea.vmem %s28_s10, 8192  ;;  %p1978_p4 = scmp.lt.s32.totalorder %s28_s10, %s28_s10 }
   0x8   :  { %p1974_p3 = scmp.ne.s32.totalorder %s28_s10, %s1973_s18  ;;  %p1979_p5 = scmp.lt.s32.totalorder %s1973_s18, %s1973_s18 }
   0xa   :  { %p1980_p6 = por %p1979_p5, %p1978_p4 }
   0xc   :  { %p1981_p7 = pnand %p1980_p6, %p1974_p3 }
   0xe   :  { %1984 = shalt.err (!%p1981_p7)
}
   0xf   :  { %s1988_s19 = smov 64   ;;  %s1989_s20 = smov 4  }
  0x10   :  { %33 = dma.hbm_to_vmem [thread:$0]  %s2555_s3, 8192, %s28_s10, [#allocation3], %s1988_s19, %s1988_s19, %s1989_s20  }
  0x11   :  { %1985 = dma.done.wait [#allocation3], 8192  }
  0x12   :  { %1986 = vsyncadd [#allocation3], 4294959104  ;;  %v2055_v0 = vld [vmem:[#allocation2 + $0x40] sm:$0xff]   ;;  %v2066_v4 = vld [vmem:[#allocation2 + $0x48] sm:$0xff]   ;;  %v1990_v22 = vmov 1983009808   ;;  %v198_v24 = vlaneseq }
  0x13   :  { %v2057_v1 = vld [vmem:[#allocation2 + $0xc0] sm:$0xff]   ;;  %1514 = vmatprep.subr.bf16.mxu0 %v2055_v0  ;;  %v2069_v5 = vld [vmem:[#allocation2 + $0xc8] sm:$0xff]   ;;  %v2078_v8 = vld [vmem:[#allocation2 + $0x50] sm:$0xff]   ;;  %v196_v23 = vunpack.c.l.s4 %v1990_v22  ;;  %vm1992_vm0 = vmmov 0   ;;  %vm891_vm1 = vcmask 1041408  }
  0x14   :  { %v2060_v2 = vld [vmem:[#allocation2] sm:$0xff]   ;;  %1536 = vmatprep.subr.bf16.mxu1 %v2057_v1  ;;  %v2072_v6 = vld [vmem:[#allocation2 + $0x8] sm:$0xff]   ;;  %v2081_v9 = vld [vmem:[#allocation2 + $0xd0] sm:$0xff]   ;;  %v199_v30 = vshrl.u32 %v198_v24, 7 }
  0x15   :  { %v2063_v3 = vld [vmem:[#allocation2 + $0x80] sm:$0xff]   ;;  %1515 = vmatpush3.bf16.msra.mxu0 %v2060_v2  ;;  %v2075_v7 = vld [vmem:[#allocation2 + $0x88] sm:$0xff]   ;;  %v2084_v10 = vld [vmem:[#allocation2 + $0x10] sm:$0xff]   ;;  %v197_v29 = vunpack.c.0.s8 %v196_v23 }
  0x16   :  { %1537 = vmatpush3.bf16.msra.mxu1 %v2063_v3  ;;  %1516 = vmatprep.subr.bf16.mxu0 %v2066_v4  ;;  %v2087_v11 = vld [vmem:[#allocation2 + $0x90] sm:$0xff]   ;;  %v2090_v12 = vld [vmem:[#allocation2 + $0x58] sm:$0xff]   ;;  %v2102_v16 = vld [vmem:[#allocation2 + $0x60] sm:$0xff]  }
  0x17   :  { %1538 = vmatprep.subr.bf16.mxu1 %v2069_v5  ;;  %v2093_v13 = vld [vmem:[#allocation2 + $0xd8] sm:$0xff]   ;;  %v2105_v17 = vld [vmem:[#allocation2 + $0xe0] sm:$0xff]   ;;  %v2114_v20 = vld [vmem:[#allocation2 + $0x68] sm:$0xff]   ;;  %v2143_v35 = vsub.s32 %v197_v29, %v199_v30 }
  0x18   :  { %v2096_v14 = vld [vmem:[#allocation2 + $0x18] sm:$0xff]   ;;  %v2108_v18 = vld [vmem:[#allocation2 + $0x20] sm:$0xff]   ;;  %v2117_v21 = vld [vmem:[#allocation2 + $0xe8] sm:$0xff]  }
  0x19   :  { %1517 = vmatpush3.bf16.msra.mxu0 %v2072_v6  ;;  %v2099_v15 = vld [vmem:[#allocation2 + $0x98] sm:$0xff]   ;;  %v2111_v19 = vld [vmem:[#allocation2 + $0xa0] sm:$0xff]   ;;  %v2120_v25 = vld [vmem:[#allocation2 + $0x28] sm:$0xff]  }
  0x1a   :  { %1539 = vmatpush3.bf16.msra.mxu1 %v2075_v7  ;;  %1518 = vmatprep.subr.bf16.mxu0 %v2078_v8  ;;  %v2123_v26 = vld [vmem:[#allocation2 + $0xa8] sm:$0xff]   ;;  %v2126_v27 = vld [vmem:[#allocation2 + $0x70] sm:$0xff]   ;;  %v2138_v33 = vld [vmem:[#allocation2 + $0x78] sm:$0xff]  }
  0x1b   :  { %1540 = vmatprep.subr.bf16.mxu1 %v2081_v9  ;;  %v2129_v28 = vld [vmem:[#allocation2 + $0xf0] sm:$0xff]   ;;  %2608 = vst [vmem:[#allocation6_spill] sm:$0xff] %v2138_v33  ;;  %v2141_v34 = vld [vmem:[#allocation2 + $0xf8] sm:$0xff]   ;;  %v190_v38 = vld [vmem:[%s2552_s0] sm:$0xff] }
  0x1c   :  { %v2132_v31 = vld [vmem:[#allocation2 + $0x30] sm:$0xff]   ;;  %v2146_v36 = vld [vmem:[#allocation2 + $0x38] sm:$0xff]   ;;  %v201_v39 = vrot.slane %v190_v38, %v2143_v35  ;;  %v194_v40 = vcombine.high %v190_v38, %v190_v38  ;;  %v2157_v41 = vld [vmem:[#allocation2 + $0x140] sm:$0xff]  }
  0x1d   :  { %1519 = vmatpush3.bf16.msra.mxu0 %v2084_v10  ;;  %2607 = vst [vmem:[#allocation5_spill] sm:$0xff] %v2132_v31  ;;  %v2135_v32 = vld [vmem:[#allocation2 + $0xb0] sm:$0xff]   ;;  %2609 = vst [vmem:[#allocation7_spill] sm:$0xff] %v2146_v36  ;;  %v2149_v37 = vld [vmem:[#allocation2 + $0xb8] sm:$0xff]  }
  0x1e   :  { %1541 = vmatpush3.bf16.msra.mxu1 %v2087_v11  ;;  %1520 = vmatprep.subr.bf16.mxu0 %v2090_v12  ;;  %2610 = vst [vmem:[#allocation8_spill] sm:$0xff] %v2157_v41  ;;  %v2159_v42 = vld [vmem:[#allocation2 + $0x1c0] sm:$0xff]   ;;  %v209_v43 = vcombine.high %v201_v39, %v201_v39  ;;  %v208_v44 = vrot.slane %v194_v40, %v2143_v35  ;;  %v2168_v51 = vld [vmem:[#allocation2 + $0x148] sm:$0xff]   ;;  %v2178_v56 = vld [vmem:[#allocation2 + $0x150] sm:$0xff]  }
  0x1f   :  { %1542 = vmatprep.subr.bf16.mxu1 %v2093_v13  ;;  %v236_v45 = vpack.c.bf16 %v201_v39, %v201_v39  ;;  %v2164_v46 = vld [vmem:[#allocation2 + $0x100] sm:$0xff]   ;;  %v2170_v53 = vld [vmem:[#allocation2 + $0x1c8] sm:$0xff]   ;;  %v2181_v57 = vld [vmem:[#allocation2 + $0x1d0] sm:$0xff]  }
  0x20   :  { %v237_v47 = vpack.c.bf16 %v209_v43, %v209_v43  ;;  %v210_v48 = vcombine.high %v208_v44, %v208_v44  ;;  %v2166_v49 = vld [vmem:[#allocation2 + $0x180] sm:$0xff]   ;;  %v238_v50 = vpack.c.bf16 %v208_v44, %v208_v44  ;;  %2611 = vst [vmem:[#allocation9_spill] sm:$0xff] %v2170_v53  ;;  %v2172_v54 = vld [vmem:[#allocation2 + $0x108] sm:$0xff]   ;;  %2613 = vst [vmem:[#allocation11_spill] sm:$0xff] %v2181_v57 }
  0x21   :  { %1521 = vmatpush3.bf16.msra.mxu0 %v2096_v14  ;;  %v2175_v55 = vld [vmem:[#allocation2 + $0x188] sm:$0xff]   ;;  %v2184_v58 = vld [vmem:[#allocation2 + $0x110] sm:$0xff]   ;;  %v2190_v60 = vld [vmem:[#allocation2 + $0x158] sm:$0xff]  }
  0x22   :  { %1543 = vmatpush3.bf16.msra.mxu1 %v2099_v15  ;;  %1522 = vmatprep.subr.bf16.mxu0 %v2102_v16  ;;  %v239_v52 = vpack.c.bf16 %v210_v48, %v210_v48  ;;  %2612 = vst [vmem:[#allocation10_spill] sm:$0xff] %v2175_v55  ;;  %v2187_v59 = vld [vmem:[#allocation2 + $0x190] sm:$0xff]   ;;  %v2193_v61 = vld [vmem:[#allocation2 + $0x1d8] sm:$0xff]   ;;  %v2202_v22 = vld [vmem:[#allocation2 + $0x160] sm:$0xff]  }
  0x23   :  { %1544 = vmatprep.subr.bf16.mxu1 %v2105_v17  ;;  %666 = vmatprep.mubr.bf16.mxu0 %v237_v47  ;;  %2614 = vst [vmem:[#allocation12_spill] sm:$0xff] %v2187_v59  ;;  %2615 = vst [vmem:[#allocation13_spill] sm:$0xff] %v2193_v61  ;;  %v2196_v62 = vld [vmem:[#allocation2 + $0x118] sm:$0xff]   ;;  %v2205_v23 = vld [vmem:[#allocation2 + $0x1e0] sm:$0xff]  }
  0x24   :  { %706 = vmatprep.mubr.bf16.mxu1 %v239_v52  ;;  %v2199_v63 = vld [vmem:[#allocation2 + $0x198] sm:$0xff]   ;;  %2617 = vst [vmem:[#allocation15_spill] sm:$0xff] %v2202_v22  ;;  %2618 = vst [vmem:[#allocation16_spill] sm:$0xff] %v2205_v23  ;;  %v2208_v24 = vld [vmem:[#allocation2 + $0x120] sm:$0xff]  }
  0x25   :  { %1523 = vmatpush3.bf16.msra.mxu0 %v2108_v18  ;;  %2616 = vst [vmem:[#allocation14_spill] sm:$0xff] %v2199_v63  ;;  %2619 = vst [vmem:[#allocation17_spill] sm:$0xff] %v2208_v24  ;;  %v2211_v29 = vld [vmem:[#allocation2 + $0x1a0] sm:$0xff]   ;;  %v2214_v30 = vld [vmem:[#allocation2 + $0x168] sm:$0xff]  }
  0x26   :  { %1545 = vmatpush3.bf16.msra.mxu1 %v2111_v19  ;;  %1524 = vmatprep.subr.bf16.mxu0 %v2114_v20  ;;  %2620 = vst [vmem:[#allocation18_spill] sm:$0xff] %v2211_v29  ;;  %2621 = vst [vmem:[#allocation19_spill] sm:$0xff] %v2214_v30  ;;  %v2217_v38 = vld [vmem:[#allocation2 + $0x1e8] sm:$0xff]   ;;  %v2226_v43 = vld [vmem:[#allocation2 + $0x170] sm:$0xff]  }
  0x27   :  { %1546 = vmatprep.subr.bf16.mxu1 %v2117_v21  ;;  %2622 = vst [vmem:[#allocation20_spill] sm:$0xff] %v2217_v38  ;;  %v2220_v39 = vld [vmem:[#allocation2 + $0x128] sm:$0xff]   ;;  %2625 = vst [vmem:[#allocation23_spill] sm:$0xff] %v2226_v43  ;;  %v2229_v44 = vld [vmem:[#allocation2 + $0x1f0] sm:$0xff]  }
  0x28   :  { %2623 = vst [vmem:[#allocation21_spill] sm:$0xff] %v2220_v39  ;;  %v2223_v40 = vld [vmem:[#allocation2 + $0x1a8] sm:$0xff]   ;;  %2626 = vst [vmem:[#allocation24_spill] sm:$0xff] %v2229_v44  ;;  %v2235_v47 = vld [vmem:[#allocation2 + $0x1b0] sm:$0xff]  }
  0x29   :  { %1525 = vmatpush3.bf16.msra.mxu0 %v2120_v25  ;;  %2624 = vst [vmem:[#allocation22_spill] sm:$0xff] %v2223_v40  ;;  %v2238_v48 = vld [vmem:[#allocation2 + $0x178] sm:$0xff]  }
  0x2a   :  { %1547 = vmatpush3.bf16.msra.mxu1 %v2123_v26  ;;  %1526 = vmatprep.subr.bf16.mxu0 %v2126_v27  ;;  %2628 = vst [vmem:[#allocation26_spill] sm:$0xff] %v2238_v48  ;;  %v2244_v52 = vld [vmem:[#allocation2 + $0x138] sm:$0xff]  }
  0x2b   :  { %1548 = vmatprep.subr.bf16.mxu1 %v2129_v28  ;;  %2629 = vst [vmem:[#allocation27_spill] sm:$0xff] %v2244_v52 }
  0x2d   :  { %1527 = vmatpush3.bf16.msra.mxu0 %v2132_v31 }
  0x2e   :  { %1549 = vmatpush3.bf16.msra.mxu1 %v2135_v32  ;;  %1528 = vmatprep.subr.bf16.mxu0 %v2138_v33 }
  0x2f   :  { %1550 = vmatprep.subr.bf16.mxu1 %v2141_v34 }
  0x31   :  { %1529 = vmatpush3.bf16.msra.mxu0 %v2146_v36 }
  0x32   :  { %1551 = vmatpush3.bf16.msra.mxu1 %v2149_v37  ;;  %1558 = vmatprep.subr.bf16.mxu0 %v2157_v41 }
  0x33   :  { %1580 = vmatprep.subr.bf16.mxu1 %v2159_v42 }
  0x34   :  { %667 = vmatmul.mubr.bf16.vlgmr.msra.gmra.mrb[0].mxu0 %v236_v45  ;;  %v2232_v45 = vld [vmem:[#allocation2 + $0x130] sm:$0xff]  }
  0x35   :  { %1559 = vmatpush3.bf16.msra.mxu0 %v2164_v46  ;;  %707 = vmatmul.mubr.bf16.vlgmr.msra.gmra.mrb[0].mxu1 %v238_v50  ;;  %2627 = vst [vmem:[#allocation25_spill] sm:$0xff] %v2232_v45  ;;  %v2241_v50 = vld [vmem:[#allocation2 + $0x1f8] sm:$0xff]  }
  0x36   :  { %1560 = vmatprep.subr.bf16.mxu0 %v2168_v51  ;;  %1581 = vmatpush3.bf16.msra.mxu1 %v2166_v49 }
  0x37   :  { %1582 = vmatprep.subr.bf16.mxu1 %v2170_v53 }
  0x39   :  { %1561 = vmatpush3.bf16.msra.mxu0 %v2172_v54 }
  0x3a   :  { %1562 = vmatprep.subr.bf16.mxu0 %v2178_v56  ;;  %1583 = vmatpush3.bf16.msra.mxu1 %v2175_v55 }
  0x3b   :  { %1584 = vmatprep.subr.bf16.mxu1 %v2181_v57 }
  0x3d   :  { %1563 = vmatpush3.bf16.msra.mxu0 %v2184_v58 }
  0x3e   :  { %1564 = vmatprep.subr.bf16.mxu0 %v2190_v60  ;;  %1585 = vmatpush3.bf16.msra.mxu1 %v2187_v59 }
  0x3f   :  { %1586 = vmatprep.subr.bf16.mxu1 %v2193_v61 }
  0x41   :  { %1565 = vmatpush3.bf16.msra.mxu0 %v2196_v62 }
  0x42   :  { %1566 = vmatprep.subr.bf16.mxu0 %v2202_v22  ;;  %1587 = vmatpush3.bf16.msra.mxu1 %v2199_v63 }
  0x43   :  { %1588 = vmatprep.subr.bf16.mxu1 %v2205_v23 }
  0x45   :  { %1567 = vmatpush3.bf16.msra.mxu0 %v2208_v24 }
  0x46   :  { %1568 = vmatprep.subr.bf16.mxu0 %v2214_v30  ;;  %1589 = vmatpush3.bf16.msra.mxu1 %v2211_v29  ;;  %v2250_v29 = vld [vmem:[#allocation2 + $0x1b8] sm:$0xff]  }
  0x47   :  { %1590 = vmatprep.subr.bf16.mxu1 %v2217_v38  ;;  %v191_v38 = vld [vmem:[%s2552_s0 + $0x8] sm:$0xff] }
  0x48   :  { %v218_v23 = vrot.slane %v191_v38, %v2143_v35  ;;  %v211_v63 = vcombine.high %v191_v38, %v191_v38  ;;  %v2322_v38 = vld [vmem:[%s2557_s5 + $0x30] sm:$0xff]  }
  0x49   :  { %1569 = vmatpush3.bf16.msra.mxu0 %v2220_v39  ;;  %2636 = vst [vmem:[#allocation34_spill] sm:$0xff] %v2322_v38 }
  0x4a   :  { %1570 = vmatprep.subr.bf16.mxu0 %v2226_v43  ;;  %1591 = vmatpush3.bf16.msra.mxu1 %v2223_v40  ;;  %v226_v40 = vcombine.high %v218_v23, %v218_v23  ;;  %v240_v61 = vpack.c.bf16 %v218_v23, %v218_v23  ;;  %v2315_v23 = vld [vmem:[%s2557_s5 + $0x28] sm:$0xff]  }
  0x4b   :  { %1592 = vmatprep.subr.bf16.mxu1 %v2229_v44  ;;  %v225_v44 = vrot.slane %v211_v63, %v2143_v35  ;;  %v2307_v63 = vld [vmem:[%s2557_s5 + $0x20] sm:$0xff]   ;;  %2635 = vst [vmem:[#allocation33_spill] sm:$0xff] %v2315_v23 }
  0x4c   :  { %v241_v59 = vpack.c.bf16 %v226_v40, %v226_v40  ;;  %2634 = vst [vmem:[#allocation32_spill] sm:$0xff] %v2307_v63  ;;  %v2329_v40 = vld [vmem:[%s2557_s5 + $0x38] sm:$0xff]  }
  0x4d   :  { %1571 = vmatpush3.bf16.msra.mxu0 %v2232_v45  ;;  %v227_v57 = vcombine.high %v225_v44, %v225_v44  ;;  %v242_v55 = vpack.c.bf16 %v225_v44, %v225_v44  ;;  %2637 = vst [vmem:[#allocation35_spill] sm:$0xff] %v2329_v40  ;;  %v2334_v44 = vld [vmem:[%s2553_s1] sm:$0xff] }
  0x4e   :  { %1572 = vmatprep.subr.bf16.mxu0 %v2238_v48  ;;  %1593 = vmatpush3.bf16.msra.mxu1 %v2235_v47 }
  0x4f   :  { %1594 = vmatprep.subr.bf16.mxu1 %v2241_v50  ;;  %746 = vmatprep.mubr.bf16.mxu0 %v241_v59  ;;  %v243_v53 = vpack.c.bf16 %v227_v57, %v227_v57  ;;  %v2286_v57 = vld [vmem:[%s2557_s5 + $0x8] sm:$0xff]   ;;  %v2293_v59 = vld [vmem:[%s2557_s5 + $0x10] sm:$0xff]  }
  0x50   :  { %2631 = vst [vmem:[#allocation29_spill] sm:$0xff] %v2286_v57  ;;  %2632 = vst [vmem:[#allocation30_spill] sm:$0xff] %v2293_v59 }
  0x51   :  { %1573 = vmatpush3.bf16.msra.mxu0 %v2244_v52  ;;  %786 = vmatprep.mubr.bf16.mxu1 %v243_v53  ;;  %v2279_v53 = vld [vmem:[%s2557_s5] sm:$0xff]  }
  0x52   :  { %1595 = vmatpush3.bf16.msra.mxu1 %v2250_v29  ;;  %2630 = vst [vmem:[#allocation28_spill] sm:$0xff] %v2279_v53 }
  0x53   :  { %1611 = vmatprep.subr.bf16.mxu1 %v2055_v0 }
  0x54   :  { %747 = vmatmul.mubr.bf16.vlgmr.msra.gmra.mrb[4].mxu0 %v240_v61  ;;  %v2300_v61 = vld [vmem:[%s2557_s5 + $0x18] sm:$0xff]  }
  0x55   :  { %787 = vmatmul.mubr.bf16.vlgmr.msra.gmra.mrb[4].mxu1 %v242_v55  ;;  %v2588_v55 = vmov 0.0   ;;  %2633 = vst [vmem:[#allocation31_spill] sm:$0xff] %v2300_v61 }
  0x56   :  { %1612 = vmatpush3.bf16.msra.mxu1 %v2060_v2  ;;  %1805 = vmatprep.subr.bf16.mxu0 %v2588_v55 }
  0x57   :  { %1613 = vmatprep.subr.bf16.mxu1 %v2066_v4  ;;  %1806 = vmatpush3.bf16.msra.mxu0 %v2279_v53 }
  0x58   :  { %1807 = vmatprep.subr.bf16.mxu0 %v2588_v55  ;;  %1821 = vmatprep.mubr.msk.bf16.mxu0 %vm1992_vm0, %v2588_v55 }
  0x5a   :  { %1614 = vmatpush3.bf16.msra.mxu1 %v2072_v6 }
  0x5b   :  { %1615 = vmatprep.subr.bf16.mxu1 %v2078_v8  ;;  %1808 = vmatpush3.bf16.msra.mxu0 %v2286_v57 }
  0x5c   :  { %1809 = vmatprep.subr.bf16.mxu0 %v2588_v55 }
  0x5e   :  { %1616 = vmatpush3.bf16.msra.mxu1 %v2084_v10 }
  0x5f   :  { %1617 = vmatprep.subr.bf16.mxu1 %v2090_v12  ;;  %1810 = vmatpush3.bf16.msra.mxu0 %v2293_v59 }
  0x60   :  { %1811 = vmatprep.subr.bf16.mxu0 %v2588_v55 }
  0x62   :  { %1618 = vmatpush3.bf16.msra.mxu1 %v2096_v14 }
  0x63   :  { %1619 = vmatprep.subr.bf16.mxu1 %v2102_v16  ;;  %1812 = vmatpush3.bf16.msra.mxu0 %v2300_v61 }
  0x64   :  { %1813 = vmatprep.subr.bf16.mxu0 %v2588_v55 }
  0x66   :  { %1620 = vmatpush3.bf16.msra.mxu1 %v2108_v18 }
  0x67   :  { %1621 = vmatprep.subr.bf16.mxu1 %v2114_v20  ;;  %1814 = vmatpush3.bf16.msra.mxu0 %v2307_v63 }
  0x68   :  { %1815 = vmatprep.subr.bf16.mxu0 %v2588_v55 }
  0x6a   :  { %1622 = vmatpush3.bf16.msra.mxu1 %v2120_v25 }
  0x6b   :  { %1623 = vmatprep.subr.bf16.mxu1 %v2126_v27  ;;  %1816 = vmatpush3.bf16.msra.mxu0 %v2315_v23 }
  0x6c   :  { %1817 = vmatprep.subr.bf16.mxu0 %v2588_v55 }
  0x6e   :  { %1624 = vmatpush3.bf16.msra.mxu1 %v2132_v31 }
  0x6f   :  { %1625 = vmatprep.subr.bf16.mxu1 %v2138_v33  ;;  %1818 = vmatpush3.bf16.msra.mxu0 %v2322_v38 }
  0x70   :  { %1819 = vmatprep.subr.bf16.mxu0 %v2588_v55 }
  0x72   :  { %1626 = vmatpush3.bf16.msra.mxu1 %v2146_v36 }
  0x73   :  { %1655 = vmatprep.subr.bf16.mxu1 %v2157_v41  ;;  %v910_v41 = vrot.slane %v2334_v44, %v2143_v35  ;;  %1820 = vmatpush3.bf16.msra.mxu0 %v2329_v40 }
  0x74   :  { %1633 = vmatprep.subr.bf16.mxu0 %v2057_v1 }
  0x75   :  { %v918_v36 = vcombine.high %v910_v41, %v910_v41  ;;  %v945_v31 = vpack.c.bf16 %v910_v41, %v910_v41 }
  0x77   :  { %v946_v33 = vpack.c.bf16 %v918_v36, %v918_v36 }
  0x79   :  { %985 = vmatprep.mubr.bf16.mxu1 %v946_v33 }
  0x7a   :  { %986 = vmatmul.mubr.bf16.vlgmr.msra.gmra.mrb[8].mxu1 %v945_v31  ;;  %v2357_v31 = vld [vmem:[%s2553_s1 + $0x8] sm:$0xff] }
  0x7b   :  { %1656 = vmatpush3.bf16.msra.mxu1 %v2164_v46  ;;  %v927_v33 = vrot.slane %v2357_v31, %v2143_v35 }
  0x7c   :  { %1657 = vmatprep.subr.bf16.mxu1 %v2168_v51 }
  0x7d   :  { %v935_v36 = vcombine.high %v927_v33, %v927_v33  ;;  %v949_v55 = vpack.c.bf16 %v927_v33, %v927_v33  ;;  %v2386_v33 = vld [vmem:[%s2556_s4] ss:$0 sm:$0xff] }
  0x7f   :  { %1658 = vmatpush3.bf16.msra.mxu1 %v2172_v54  ;;  %v950_v41 = vpack.c.bf16 %v935_v36, %v935_v36 }
  0x80   :  { %1659 = vmatprep.subr.bf16.mxu1 %v2178_v56 }
  0x81   :  { %1065 = vmatprep.mubr.bf16.mxu1 %v950_v41 }
  0x83   :  { %1660 = vmatpush3.bf16.msra.mxu1 %v2184_v58 }
  0x84   :  { %1661 = vmatprep.subr.bf16.mxu1 %v2190_v60 }
  0x87   :  { %1662 = vmatpush3.bf16.msra.mxu1 %v2196_v62 }
  0x88   :  { %1663 = vmatprep.subr.bf16.mxu1 %v2202_v22 }
  0x8b   :  { %1664 = vmatpush3.bf16.msra.mxu1 %v2208_v24 }
  0x8c   :  { %1665 = vmatprep.subr.bf16.mxu1 %v2214_v30 }
  0x8f   :  { %1666 = vmatpush3.bf16.msra.mxu1 %v2220_v39  ;;  %v2638_v39 = vmov 0.0  }
  0x90   :  { %1667 = vmatprep.subr.bf16.mxu1 %v2226_v43 }
  0x93   :  { %1668 = vmatpush3.bf16.msra.mxu1 %v2232_v45 }
  0x94   :  { %1669 = vmatprep.subr.bf16.mxu1 %v2238_v48 }
  0x97   :  { %1670 = vmatpush3.bf16.msra.mxu1 %v2244_v52 }
  0x98   :  { %1825 = vmatprep.subr.bf16.mxu1 %v2638_v39 }
  0x9a   :  { %1066 = vmatmul.mubr.bf16.vlgmr.msra.gmra.mrb[12].mxu1 %v949_v55 }
  0x9b   :  { %1826 = vmatpush3.bf16.msra.mxu1 %v2279_v53  ;;  %1841 = vmatprep.mubr.msk.bf16.mxu1 %vm1992_vm0, %v2638_v39 }
  0x9c   :  { %1827 = vmatprep.subr.bf16.mxu1 %v2638_v39 }
  0x9f   :  { %1828 = vmatpush3.bf16.msra.mxu1 %v2286_v57 }
  0xa0   :  { %1829 = vmatprep.subr.bf16.mxu1 %v2638_v39 }
  0xa3   :  { %1830 = vmatpush3.bf16.msra.mxu1 %v2293_v59 }
  0xa4   :  { %1831 = vmatprep.subr.bf16.mxu1 %v2638_v39 }
  0xa7   :  { %1832 = vmatpush3.bf16.msra.mxu1 %v2300_v61 }
  0xa8   :  { %1833 = vmatprep.subr.bf16.mxu1 %v2638_v39 }
  0xab   :  { %1834 = vmatpush3.bf16.msra.mxu1 %v2307_v63 }
  0xac   :  { %1835 = vmatprep.subr.bf16.mxu1 %v2638_v39 }
  0xaf   :  { %1836 = vmatpush3.bf16.msra.mxu1 %v2315_v23 }
  0xb0   :  { %1837 = vmatprep.subr.bf16.mxu1 %v2638_v39 }
  0xb3   :  { %1838 = vmatpush3.bf16.msra.mxu1 %v2322_v38 }
  0xb4   :  { %1839 = vmatprep.subr.bf16.mxu1 %v2638_v39 }
  0xb7   :  { %1840 = vmatpush3.bf16.msra.mxu1 %v2329_v40 }
  0xb8   :  { %1730 = vmatprep.subr.bf16.mxu1 %v2057_v1  ;;  %v903_v1 = vcombine.high %v2334_v44, %v2334_v44 }
  0xba   :  { %v917_v45 = vrot.slane %v903_v1, %v2143_v35 }
 0x107   :  { %v1530_v55 = vpop.f32.mrb[0].mxu0 }
 0x108   :  { %v1531_v36 = vpop.f32.mrb[1].mxu0  ;;  %v1552_v41 = vpop.f32.mrb[0].mxu1 }
 0x109   :  { %v1532_v63 = vadd.f32 %v1531_v36, %v1530_v55  ;;  %v1533_v23 = vpop.f32.mrb[2].mxu0  ;;  %v1553_v61 = vpop.f32.mrb[1].mxu1 }
 0x10a   :  { %v1534_v59 = vpop.f32.mrb[3].mxu0  ;;  %v1554_v57 = vadd.f32 %v1553_v61, %v1552_v41  ;;  %v1555_v53 = vpop.f32.mrb[2].mxu1  ;;  %v919_v61 = vcombine.high %v917_v45, %v917_v45  ;;  %v2450_v41 = vld [vmem:[%s2554_s2] sm:$0xff] }
 0x10b   :  { %v669_v38 = vadd.f32 %v1532_v63, %v2386_v33  ;;  %v1556_v39 = vpop.f32.mrb[3].mxu1  ;;  %v1174_v1 = vrot.slane %v2450_v41, %v2143_v35 }
 0x10d   :  { %v709_v40 = vadd.f32 %v1554_v57, %v669_v38  ;;  %v948_v57 = vpack.c.bf16 %v919_v61, %v919_v61  ;;  %v2656_v61 = vld [vmem:[#allocation19_spill] sm:$0xff] }
 0x127   :  { %v1574_v52 = vpop.f32.mrb[4].mxu0 }
 0x128   :  { %v1575_v48 = vpop.f32.mrb[5].mxu0  ;;  %v1596_v43 = vpop.f32.mrb[4].mxu1 }
 0x129   :  { %v1576_v30 = vadd.f32 %v1575_v48, %v1574_v52  ;;  %v1577_v24 = vpop.f32.mrb[6].mxu0  ;;  %v1597_v55 = vpop.f32.mrb[5].mxu1  ;;  %v2647_v48 = vld [vmem:[#allocation20_spill] sm:$0xff]  ;;  %v2648_v52 = vld [vmem:[#allocation22_spill] sm:$0xff] }
 0x12a   :  { %v1578_v23 = vpop.f32.mrb[7].mxu0  ;;  %v1598_v59 = vadd.f32 %v1597_v55, %v1596_v43  ;;  %v1599_v22 = vpop.f32.mrb[6].mxu1  ;;  %v2643_v24 = vld [vmem:[#allocation13_spill] sm:$0xff]  ;;  %v2645_v43 = vld [vmem:[#allocation16_spill] sm:$0xff]  ;;  %v1182_v55 = vcombine.high %v1174_v1, %v1174_v1 }
 0x12b   :  { %v749_v36 = vadd.f32 %v1576_v30, %v709_v40  ;;  %v1600_v63 = vpop.f32.mrb[7].mxu1  ;;  %v2642_v22 = vld [vmem:[#allocation12_spill] sm:$0xff]  ;;  %v2644_v30 = vld [vmem:[#allocation14_spill] sm:$0xff] }
 0x12c   :  { %v2649_v40 = vld [vmem:[#allocation24_spill] sm:$0xff]  ;;  %v1210_v23 = vpack.c.bf16 %v1182_v55, %v1182_v55  ;;  %v2655_v63 = vld [vmem:[#allocation17_spill] sm:$0xff] }
 0x12d   :  { %v789_v53 = vadd.f32 %v1598_v59, %v749_v36  ;;  %v1209_v36 = vpack.c.bf16 %v1174_v1, %v1174_v1  ;;  %v2654_v59 = vld [vmem:[#allocation15_spill] sm:$0xff] }
 0x12f   :  { %v794_v39 = vmax.f32 %v789_v53, 0.0  ;;  %v2657_v53 = vld [vmem:[#allocation21_spill] sm:$0xff] }
 0x131   :  { %v795_v38 = vpack.c.bf16 %v794_v39, %v794_v39  ;;  %v2661_v39 = vld [vmem:[#allocation27_spill] sm:$0xff] }
 0x133   :  { %1822 = vmatmul.mubr.bf16.vlgmr.msra.gmra.mrb[8].mxu0 %v795_v38  ;;  %v2662_v38 = vmov 0.0  }
 0x134   :  { %1634 = vmatpush3.bf16.msra.mxu0 %v2063_v3  ;;  %1025 = vmatprep.mubr.bf16.mxu0 %v948_v57  ;;  %v920_v3 = vcombine.high %v2357_v31, %v2357_v31 }
 0x135   :  { %1635 = vmatprep.subr.bf16.mxu0 %v2069_v5 }
 0x136   :  { %v934_v5 = vrot.slane %v920_v3, %v2143_v35  ;;  %v2663_v3 = vld [vmem:[#allocation28_spill] sm:$0xff] }
 0x138   :  { %1636 = vmatpush3.bf16.msra.mxu0 %v2075_v7  ;;  %v936_v7 = vcombine.high %v934_v5, %v934_v5  ;;  %v951_v44 = vpack.c.bf16 %v934_v5, %v934_v5  ;;  %v2664_v5 = vld [vmem:[#allocation29_spill] sm:$0xff] }
 0x139   :  { %1637 = vmatprep.subr.bf16.mxu0 %v2081_v9  ;;  %v947_v9 = vpack.c.bf16 %v917_v45, %v917_v45  ;;  %v2646_v45 = vld [vmem:[#allocation18_spill] sm:$0xff] }
 0x13c   :  { %1638 = vmatpush3.bf16.msra.mxu0 %v2087_v11  ;;  %v952_v11 = vpack.c.bf16 %v936_v7, %v936_v7  ;;  %v2665_v7 = vld [vmem:[#allocation30_spill] sm:$0xff] }
 0x13d   :  { %1639 = vmatprep.subr.bf16.mxu0 %v2093_v13  ;;  %v2639_v13 = vld [vmem:[#allocation9_spill] sm:$0xff] }
 0x140   :  { %1640 = vmatpush3.bf16.msra.mxu0 %v2099_v15  ;;  %v2640_v15 = vld [vmem:[#allocation10_spill] sm:$0xff] }
 0x141   :  { %1641 = vmatprep.subr.bf16.mxu0 %v2105_v17  ;;  %v2641_v17 = vld [vmem:[#allocation11_spill] sm:$0xff] }
 0x144   :  { %1642 = vmatpush3.bf16.msra.mxu0 %v2111_v19 }
 0x145   :  { %1643 = vmatprep.subr.bf16.mxu0 %v2117_v21 }
 0x148   :  { %1644 = vmatpush3.bf16.msra.mxu0 %v2123_v26 }
 0x149   :  { %1645 = vmatprep.subr.bf16.mxu0 %v2129_v28 }
 0x14c   :  { %1646 = vmatpush3.bf16.msra.mxu0 %v2135_v32 }
 0x14d   :  { %1647 = vmatprep.subr.bf16.mxu0 %v2141_v34 }
 0x150   :  { %1648 = vmatpush3.bf16.msra.mxu0 %v2149_v37 }
 0x151   :  { %1677 = vmatprep.subr.bf16.mxu0 %v2159_v42 }
 0x153   :  { %1026 = vmatmul.mubr.bf16.vlgmr.msra.gmra.mrb[12].mxu0 %v947_v9  ;;  %v2666_v9 = vld [vmem:[#allocation31_spill] sm:$0xff] }
 0x154   :  { %1678 = vmatpush3.bf16.msra.mxu0 %v2166_v49  ;;  %1105 = vmatprep.mubr.bf16.mxu0 %v952_v11  ;;  %v2490_v11 = vld [vmem:[%s2558_s6] ss:$0 sm:$0xff] }
 0x155   :  { %1679 = vmatprep.subr.bf16.mxu0 %v2639_v13 }
 0x158   :  { %1680 = vmatpush3.bf16.msra.mxu0 %v2640_v15 }
 0x159   :  { %1681 = vmatprep.subr.bf16.mxu0 %v2641_v17 }
 0x15c   :  { %1682 = vmatpush3.bf16.msra.mxu0 %v2642_v22 }
 0x15d   :  { %1683 = vmatprep.subr.bf16.mxu0 %v2643_v24 }
 0x160   :  { %1684 = vmatpush3.bf16.msra.mxu0 %v2644_v30 }
 0x161   :  { %1685 = vmatprep.subr.bf16.mxu0 %v2645_v43 }
 0x164   :  { %1686 = vmatpush3.bf16.msra.mxu0 %v2646_v45 }
 0x165   :  { %1687 = vmatprep.subr.bf16.mxu0 %v2647_v48 }
 0x168   :  { %1688 = vmatpush3.bf16.msra.mxu0 %v2648_v52 }
 0x169   :  { %1689 = vmatprep.subr.bf16.mxu0 %v2649_v40 }
 0x16c   :  { %1690 = vmatpush3.bf16.msra.mxu0 %v2235_v47 }
 0x16d   :  { %1691 = vmatprep.subr.bf16.mxu0 %v2241_v50 }
 0x170   :  { %1692 = vmatpush3.bf16.msra.mxu0 %v2250_v29 }
 0x171   :  { %1708 = vmatprep.subr.bf16.mxu0 %v2055_v0  ;;  %v1627_v0 = vpop.f32.mrb[8].mxu1 }
 0x173   :  { %1106 = vmatmul.mubr.bf16.vlgmr.msra.gmra.mrb[16].mxu0 %v951_v44  ;;  %v2667_v44 = vld [vmem:[#allocation32_spill] sm:$0xff] }
 0x174   :  { %1709 = vmatpush3.bf16.msra.mxu0 %v2060_v2  ;;  %v2650_v2 = vld [vmem:[#allocation5_spill] sm:$0xff]  ;;  %1249 = vmatprep.mubr.bf16.mxu0 %v1210_v23 }
 0x175   :  { %1710 = vmatprep.subr.bf16.mxu0 %v2066_v4  ;;  %v1628_v4 = vpop.f32.mrb[9].mxu1 }
 0x178   :  { %1711 = vmatpush3.bf16.msra.mxu0 %v2072_v6  ;;  %v2651_v6 = vld [vmem:[#allocation6_spill] sm:$0xff] }
 0x179   :  { %1712 = vmatprep.subr.bf16.mxu0 %v2078_v8  ;;  %v2441_v8 = vadd.f32 %v1628_v4, %v1627_v0 }
 0x17c   :  { %1713 = vmatpush3.bf16.msra.mxu0 %v2084_v10  ;;  %v1630_v10 = vpop.f32.mrb[10].mxu1 }
 0x17d   :  { %1714 = vmatprep.subr.bf16.mxu0 %v2090_v12  ;;  %v1631_v12 = vpop.f32.mrb[11].mxu1  ;;  %v2668_v10 = vld [vmem:[#allocation33_spill] sm:$0xff] }
 0x180   :  { %1715 = vmatpush3.bf16.msra.mxu0 %v2096_v14  ;;  %v2652_v14 = vld [vmem:[#allocation7_spill] sm:$0xff] }
 0x181   :  { %1716 = vmatprep.subr.bf16.mxu0 %v2102_v16  ;;  %v2653_v16 = vld [vmem:[#allocation8_spill] sm:$0xff] }
 0x184   :  { %1717 = vmatpush3.bf16.msra.mxu0 %v2108_v18  ;;  %v1671_v18 = vpop.f32.mrb[12].mxu1 }
 0x185   :  { %1718 = vmatprep.subr.bf16.mxu0 %v2114_v20  ;;  %v1672_v20 = vpop.f32.mrb[13].mxu1 }
 0x186   :  { %v2445_v31 = vadd.f32 %v1672_v20, %v1671_v18  ;;  %v2669_v18 = vld [vmem:[#allocation34_spill] sm:$0xff]  ;;  %v2670_v20 = vld [vmem:[#allocation35_spill] sm:$0xff] }
 0x188   :  { %1719 = vmatpush3.bf16.msra.mxu0 %v2120_v25  ;;  %v1674_v25 = vpop.f32.mrb[14].mxu1 }
 0x189   :  { %1720 = vmatprep.subr.bf16.mxu0 %v2126_v27  ;;  %v1675_v27 = vpop.f32.mrb[15].mxu1  ;;  %v988_v25 = vadd.f32 %v2441_v8, %v2386_v33 }
 0x18c   :  { %1721 = vmatpush3.bf16.msra.mxu0 %v2650_v2 }
 0x18d   :  { %1722 = vmatprep.subr.bf16.mxu0 %v2651_v6 }
 0x190   :  { %1723 = vmatpush3.bf16.msra.mxu0 %v2652_v14 }
 0x191   :  { %1752 = vmatprep.subr.bf16.mxu0 %v2653_v16 }
 0x193   :  { %1250 = vmatmul.mubr.bf16.vlgmr.msra.gmra.mrb[20].mxu0 %v1209_v36 }
 0x194   :  { %1753 = vmatpush3.bf16.msra.mxu0 %v2164_v46  ;;  %v2658_v46 = vld [vmem:[#allocation23_spill] sm:$0xff] }
 0x195   :  { %1754 = vmatprep.subr.bf16.mxu0 %v2168_v51  ;;  %v2469_v51 = vld [vmem:[%s2554_s2 + $0x8] sm:$0xff] }
 0x198   :  { %1755 = vmatpush3.bf16.msra.mxu0 %v2172_v54  ;;  %v1191_v54 = vrot.slane %v2469_v51, %v2143_v35 }
 0x199   :  { %1756 = vmatprep.subr.bf16.mxu0 %v2178_v56  ;;  %v2659_v56 = vld [vmem:[#allocation25_spill] sm:$0xff] }
 0x19a   :  { %v1213_v57 = vpack.c.bf16 %v1191_v54, %v1191_v54 }
 0x19c   :  { %1757 = vmatpush3.bf16.msra.mxu0 %v2184_v58  ;;  %v2660_v58 = vld [vmem:[#allocation26_spill] sm:$0xff] }
 0x19d   :  { %1758 = vmatprep.subr.bf16.mxu0 %v2190_v60  ;;  %v1199_v60 = vcombine.high %v1191_v54, %v1191_v54 }
 0x1a0   :  { %1759 = vmatpush3.bf16.msra.mxu0 %v2196_v62  ;;  %v1214_v62 = vpack.c.bf16 %v1199_v60, %v1199_v60 }
 0x1a1   :  { %1760 = vmatprep.subr.bf16.mxu0 %v2654_v59 }
 0x1a2   :  { %1329 = vmatprep.mubr.bf16.mxu0 %v1214_v62 }
 0x1a4   :  { %1761 = vmatpush3.bf16.msra.mxu0 %v2655_v63 }
 0x1a5   :  { %1762 = vmatprep.subr.bf16.mxu0 %v2656_v61  ;;  %v1167_v61 = vcombine.high %v2450_v41, %v2450_v41  ;;  %v1958_v41 = vld [vmem:[#allocation2 + $0xd0] sm:$0xff]  }
 0x1a8   :  { %1763 = vmatpush3.bf16.msra.mxu0 %v2657_v53  ;;  %v1181_v53 = vrot.slane %v1167_v61, %v2143_v35 }
 0x1a9   :  { %1764 = vmatprep.subr.bf16.mxu0 %v2658_v46 }
 0x1aa   :  { %v1183_v62 = vcombine.high %v1181_v53, %v1181_v53 }
 0x1ac   :  { %1765 = vmatpush3.bf16.msra.mxu0 %v2659_v56 }
 0x1ad   :  { %1766 = vmatprep.subr.bf16.mxu0 %v2660_v58 }
 0x1b0   :  { %1767 = vmatpush3.bf16.msra.mxu0 %v2661_v39 }
 0x1b1   :  { %1845 = vmatprep.subr.bf16.mxu0 %v2662_v38 }
 0x1b3   :  { %1330 = vmatmul.mubr.bf16.vlgmr.msra.gmra.mrb[24].mxu0 %v1213_v57  ;;  %v1212_v57 = vpack.c.bf16 %v1183_v62, %v1183_v62 }
 0x1b4   :  { %1846 = vmatpush3.bf16.msra.mxu0 %v2663_v3  ;;  %1861 = vmatprep.mubr.msk.bf16.mxu0 %vm1992_vm0, %v2662_v38  ;;  %v1955_v3 = vld [vmem:[#allocation2 + $0x80] sm:$0xff]  }
 0x1b5   :  { %1847 = vmatprep.subr.bf16.mxu0 %v2662_v38 }
 0x1b8   :  { %1848 = vmatpush3.bf16.msra.mxu0 %v2664_v5  ;;  %v1957_v5 = vld [vmem:[#allocation2 + $0x88] sm:$0xff]  }
 0x1b9   :  { %1849 = vmatprep.subr.bf16.mxu0 %v2662_v38 }
 0x1bc   :  { %1850 = vmatpush3.bf16.msra.mxu0 %v2665_v7  ;;  %v1959_v7 = vld [vmem:[#allocation2 + $0x90] sm:$0xff]  }
 0x1bd   :  { %1851 = vmatprep.subr.bf16.mxu0 %v2662_v38 }
 0x1c0   :  { %1852 = vmatpush3.bf16.msra.mxu0 %v2666_v9  ;;  %v1960_v9 = vld [vmem:[#allocation2 + $0xd8] sm:$0xff]  }
 0x1c1   :  { %1853 = vmatprep.subr.bf16.mxu0 %v2662_v38 }
 0x1c4   :  { %1854 = vmatpush3.bf16.msra.mxu0 %v2667_v44  ;;  %v1961_v44 = vld [vmem:[#allocation2 + $0x98] sm:$0xff]  }
 0x1c5   :  { %1855 = vmatprep.subr.bf16.mxu0 %v2662_v38 }
 0x1c8   :  { %1856 = vmatpush3.bf16.msra.mxu0 %v2668_v10 }
 0x1c9   :  { %1857 = vmatprep.subr.bf16.mxu0 %v2662_v38 }
 0x1cc   :  { %1858 = vmatpush3.bf16.msra.mxu0 %v2669_v18 }
 0x1cd   :  { %1859 = vmatprep.subr.bf16.mxu0 %v2662_v38 }
 0x1d0   :  { %1860 = vmatpush3.bf16.msra.mxu0 %v2670_v20 }
 0x206   :  { %v884_v0 = vpop.f32.mrb[8].mxu0 }
 0x207   :  { %v2495_v2 = vadd.f32 %v2490_v11, %v884_v0  ;;  %v1823_v4 = vpop.f32.mrb[9].mxu0  ;;  %v1962_v0 = vld [vmem:[#allocation2 + $0xe0] sm:$0xff]  }
 0x208   :  { %v887_v6 = vpop.f32.mrb[10].mxu0  ;;  %v1184_v4 = vcombine.high %v2469_v51, %v2469_v51 }
 0x209   :  { %v1824_v12 = vpop.f32.mrb[11].mxu0  ;;  %v890_v14 = vmul.f32 %v2495_v2, %v2495_v2 }
 0x20a   :  { %v1198_v6 = vrot.slane %v1184_v4, %v2143_v35  ;;  %v1211_v12 = vpack.c.bf16 %v1181_v53, %v1181_v53 }
 0x20b   :  { %v892_v16 = vsel %vm891_vm1, %v890_v14, 0.0 }
 0x20c   :  { %893 = vadd.xlane.f32.xlu0 %v892_v16  ;;  %v1200_v10 = vcombine.high %v1198_v6, %v1198_v6 }
 0x226   :  { %v1649_v27 = vpop.f32.mrb[12].mxu0 }
 0x227   :  { %v1650_v1 = vpop.f32.mrb[13].mxu0 }
 0x228   :  { %v1651_v55 = vadd.f32 %v1650_v1, %v1649_v27  ;;  %v1652_v23 = vpop.f32.mrb[14].mxu0 }
 0x229   :  { %v1653_v36 = vpop.f32.mrb[15].mxu0 }
 0x22a   :  { %v1028_v59 = vadd.f32 %v1651_v55, %v988_v25 }
 0x22c   :  { %v1068_v63 = vadd.f32 %v2445_v31, %v1028_v59  ;;  %v1956_v31 = vld [vmem:[#allocation2 + $0xc8] sm:$0xff]  }
 0x246   :  { %v1693_v46 = vpop.f32.mrb[16].mxu0 }
 0x247   :  { %v1694_v54 = vpop.f32.mrb[17].mxu0 }
 0x248   :  { %v1695_v56 = vadd.f32 %v1694_v54, %v1693_v46  ;;  %v1696_v58 = vpop.f32.mrb[18].mxu0 }
 0x249   :  { %v1697_v60 = vpop.f32.mrb[19].mxu0 }
 0x24a   :  { %v1108_v8 = vadd.f32 %v1695_v56, %v1068_v63 }
 0x24c   :  { %v1113_v39 = vmax.f32 %v1108_v8, 0.0 }
 0x24e   :  { %v1114_v38 = vpack.c.bf16 %v1113_v39, %v1113_v39 }
 0x250   :  { %1842 = vmatmul.mubr.bf16.vlgmr.msra.gmra.mrb[16].mxu1 %v1114_v38 }
 0x251   :  { %1731 = vmatpush3.bf16.msra.mxu1 %v1955_v3  ;;  %1289 = vmatprep.mubr.bf16.mxu1 %v1212_v57 }
 0x252   :  { %1732 = vmatprep.subr.bf16.mxu1 %v1956_v31 }
 0x255   :  { %1733 = vmatpush3.bf16.msra.mxu1 %v1957_v5 }
 0x256   :  { %1734 = vmatprep.subr.bf16.mxu1 %v1958_v41 }
 0x259   :  { %1735 = vmatpush3.bf16.msra.mxu1 %v1959_v7 }
 0x25a   :  { %1736 = vmatprep.subr.bf16.mxu1 %v1960_v9 }
 0x25d   :  { %1737 = vmatpush3.bf16.msra.mxu1 %v1961_v44 }
 0x25e   :  { %1738 = vmatprep.subr.bf16.mxu1 %v1962_v0 }
 0x261   :  { %1739 = vmatpush3.bf16.msra.mxu1 %v2111_v19  ;;  %v1216_v19 = vpack.c.bf16 %v1200_v10, %v1200_v10 }
 0x262   :  { %1740 = vmatprep.subr.bf16.mxu1 %v2117_v21  ;;  %v1215_v21 = vpack.c.bf16 %v1198_v6, %v1198_v6 }
 0x265   :  { %1741 = vmatpush3.bf16.msra.mxu1 %v2123_v26 }
 0x266   :  { %1742 = vmatprep.subr.bf16.mxu1 %v2129_v28  ;;  %v1724_v35 = vpop.f32.mrb[20].mxu0 }
 0x269   :  { %1743 = vmatpush3.bf16.msra.mxu1 %v2135_v32 }
 0x26a   :  { %1744 = vmatprep.subr.bf16.mxu1 %v2141_v34 }
 0x26d   :  { %1745 = vmatpush3.bf16.msra.mxu1 %v2149_v37  ;;  %v1725_v37 = vpop.f32.mrb[21].mxu0 }
 0x26e   :  { %1774 = vmatprep.subr.bf16.mxu1 %v2159_v42  ;;  %v1726_v42 = vadd.f32 %v1725_v37, %v1724_v35 }
 0x270   :  { %1290 = vmatmul.mubr.bf16.vlgmr.msra.gmra.mrb[20].mxu1 %v1211_v12 }
 0x271   :  { %1775 = vmatpush3.bf16.msra.mxu1 %v2166_v49  ;;  %1369 = vmatprep.mubr.bf16.mxu1 %v1216_v19  ;;  %v1727_v49 = vpop.f32.mrb[22].mxu0 }
 0x272   :  { %1776 = vmatprep.subr.bf16.mxu1 %v2639_v13 }
 0x275   :  { %1777 = vmatpush3.bf16.msra.mxu1 %v2640_v15 }
 0x276   :  { %1778 = vmatprep.subr.bf16.mxu1 %v2641_v17 }
 0x279   :  { %1779 = vmatpush3.bf16.msra.mxu1 %v2642_v22 }
 0x27a   :  { %1780 = vmatprep.subr.bf16.mxu1 %v2643_v24 }
 0x27d   :  { %1781 = vmatpush3.bf16.msra.mxu1 %v2644_v30 }
 0x27e   :  { %1782 = vmatprep.subr.bf16.mxu1 %v2645_v43 }
 0x281   :  { %1783 = vmatpush3.bf16.msra.mxu1 %v2646_v45 }
 0x282   :  { %1784 = vmatprep.subr.bf16.mxu1 %v2647_v48 }
 0x285   :  { %1785 = vmatpush3.bf16.msra.mxu1 %v2648_v52 }
 0x286   :  { %1786 = vmatprep.subr.bf16.mxu1 %v2649_v40  ;;  %v1252_v40 = vadd.f32 %v1726_v42, %v2386_v33 }
 0x289   :  { %1787 = vmatpush3.bf16.msra.mxu1 %v2235_v47  ;;  %v1728_v47 = vpop.f32.mrb[23].mxu0 }
 0x28a   :  { %1788 = vmatprep.subr.bf16.mxu1 %v2241_v50  ;;  %v1768_v50 = vpop.f32.mrb[24].mxu0 }
 0x28b   :  { %v1769_v13 = vpop.f32.mrb[25].mxu0 }
 0x28c   :  { %v1770_v15 = vadd.f32 %v1769_v13, %v1768_v50 }
 0x28d   :  { %1789 = vmatpush3.bf16.msra.mxu1 %v2250_v29  ;;  %v1771_v29 = vpop.f32.mrb[26].mxu0 }
 0x28e   :  { %v1772_v17 = vpop.f32.mrb[27].mxu0 }
 0x290   :  { %1370 = vmatmul.mubr.bf16.vlgmr.msra.gmra.mrb[24].mxu1 %v1215_v21 }
 0x299   :  { %v894_v26 = vpop.xlane.xlu0 %893 }
 0x29a   :  { %v895_v28 = vmax.f32 %v894_v26, 1e-24 }
 0x29c   :  { %1949 = vrsqrt.f32 %v895_v28 }
 0x2a6   :  { %v1950_v32 = vpop.eup %1949 }
 0x2a7   :  { %v897_v34 = vmul.f32 %v1950_v32, %v2495_v2 }
 0x2a9   :  { %898 = vst [vmem:[%s2559_s7] sm:$0x3] %v897_v34 }
 0x323   :  { %v1149_v22 = vpop.f32.mrb[16].mxu1 }
 0x324   :  { %v1150_v24 = vadd.f32 %v2490_v11, %v1149_v22  ;;  %v1843_v30 = vpop.f32.mrb[17].mxu1 }
 0x325   :  { %v1152_v43 = vpop.f32.mrb[18].mxu1 }
 0x326   :  { %v1844_v45 = vpop.f32.mrb[19].mxu1  ;;  %v1155_v48 = vmul.f32 %v1150_v24, %v1150_v24 }
 0x328   :  { %v1156_v52 = vsel %vm891_vm1, %v1155_v48, 0.0 }
 0x329   :  { %1157 = vadd.xlane.f32.xlu0 %v1156_v52 }
 0x343   :  { %v1746_v51 = vpop.f32.mrb[20].mxu1 }
 0x344   :  { %v1747_v2 = vpop.f32.mrb[21].mxu1 }
 0x345   :  { %v1748_v14 = vadd.f32 %v1747_v2, %v1746_v51  ;;  %v1749_v16 = vpop.f32.mrb[22].mxu1 }
 0x346   :  { %v1750_v18 = vpop.f32.mrb[23].mxu1 }
 0x347   :  { %v1292_v20 = vadd.f32 %v1748_v14, %v1252_v40 }
 0x349   :  { %v1332_v25 = vadd.f32 %v1770_v15, %v1292_v20 }
 0x363   :  { %v1790_v27 = vpop.f32.mrb[24].mxu1 }
 0x364   :  { %v1791_v1 = vpop.f32.mrb[25].mxu1 }
 0x365   :  { %v1792_v55 = vadd.f32 %v1791_v1, %v1790_v27  ;;  %v1793_v23 = vpop.f32.mrb[26].mxu1 }
 0x366   :  { %v1794_v36 = vpop.f32.mrb[27].mxu1 }
 0x367   :  { %v1372_v59 = vadd.f32 %v1792_v55, %v1332_v25 }
 0x369   :  { %v1377_v63 = vmax.f32 %v1372_v59, 0.0 }
 0x36b   :  { %v1378_v61 = vpack.c.bf16 %v1377_v63, %v1377_v63 }
 0x36d   :  { %1862 = vmatmul.mubr.bf16.vlgmr.msra.gmra.mrb[28].mxu0 %v1378_v61 }
 0x3b6   :  { %v1158_v53 = vpop.xlane.xlu0 %1157 }
 0x3b7   :  { %v1159_v46 = vmax.f32 %v1158_v53, 1e-24 }
 0x3b9   :  { %1951 = vrsqrt.f32 %v1159_v46 }
 0x3c3   :  { %v1952_v33 = vpop.eup %1951 }
 0x3c4   :  { %v1161_v54 = vmul.f32 %v1952_v33, %v1150_v24 }
 0x3c6   :  { %1162 = vst [vmem:[%s2560_s8] sm:$0x3] %v1161_v54 }
 0x440   :  { %v1413_v56 = vpop.f32.mrb[28].mxu0 }
 0x441   :  { %v1414_v58 = vadd.f32 %v2490_v11, %v1413_v56  ;;  %v1863_v60 = vpop.f32.mrb[29].mxu0 }
 0x442   :  { %v1416_v62 = vpop.f32.mrb[30].mxu0 }
 0x443   :  { %v1864_v8 = vpop.f32.mrb[31].mxu0  ;;  %v1419_v39 = vmul.f32 %v1414_v58, %v1414_v58 }
 0x445   :  { %v1420_v57 = vsel %vm891_vm1, %v1419_v39, 0.0 }
 0x446   :  { %1421 = vadd.xlane.f32.xlu1 %v1420_v57 }
 0x4d3   :  { %v1422_v38 = vpop.xlane.xlu1 %1421 }
 0x4d4   :  { %v1423_v3 = vmax.f32 %v1422_v38, 1e-24 }
 0x4d6   :  { %1953 = vrsqrt.f32 %v1423_v3 }
 0x4e0   :  { %v1954_v31 = vpop.eup %1953 }
 0x4e1   :  { %v1425_v5 = vmul.f32 %v1954_v31, %v1414_v58 }
 0x4e3   :  { %1426 = vst [vmem:[%s2561_s9] sm:$0x3] %v1425_v5 }
 0x4e4   :  { %1439 = vsyncpa [#allocation3], 1 }

</bundles_post_ra>
